<compile_context>
chip_gen: v7x
topology: tpu7x:2x2x1
jax: 0.10.0
libtpu: 0.0.40
codegen_flags: <defaults>
</compile_context>

<pallas_src>
import functools

import jax
import jax.numpy as jnp
from jax.experimental import pallas as pl
from jax.experimental.pallas import tpu as pltpu


def _round_up(x, m):
    return ((x + m - 1) // m) * m


def _tpu_budget():
    """Per-generation VMEM / tiling budgets (v5e/v6e: 128 MiB VMEM, v7x: 64 MiB/TC)."""
    vmem_cap = 64 * 1024 * 1024
    try:
        info = pltpu.get_tpu_info()
        vmem_cap = int(getattr(info, "vmem_capacity_bytes", vmem_cap))
    except Exception:
        pass
    if vmem_cap >= 100 * 1024 * 1024:        # v5e / v6e (128 MiB VMEM)
        return dict(vmem_limit=64 * 1024 * 1024, tk_max=2048,
                    resident_w_bb_budget=16 * 1024 * 1024)
    # v7x: only 64 MiB per TensorCore -> conservative scoped budget & tiles.
    return dict(vmem_limit=32 * 1024 * 1024, tk_max=1024,
                resident_w_bb_budget=8 * 1024 * 1024)


def _finetune_kernel(x_ref, w_bb_ref, b_bb_ref, w_cls_ref, b_cls_ref,
                     out_ref, acc_ref, *, tk, w_bb_resident, compute_dtype):
    """Fused (flatten -> Linear -> ReLU) backbone + Linear classifier.

    Grid = (batch tiles i, K tiles k); K is the reduction over flattened D_in.
      x_ref:     [tm, tk]              f32   (flattened-image tile, cast in-kernel)
      w_bb_ref:  [tk, F_pad] or        bf16  (streamed per K tile, or fully
                 [D_in_pad, F_pad]             VMEM-resident, sliced with pl.ds)
      b_bb_ref:  [1, F_pad]            f32   (resident)
      w_cls_ref: [F_pad, C_pad]        bf16  (resident)
      b_cls_ref: [1, C_pad]            f32   (resident)
      out_ref:   [tm, C_pad]           f32
      acc_ref:   [tm, F_pad]           f32   VMEM scratch accumulator
    """
    k = pl.program_id(1)

    @pl.when(k == 0)
    def _():
        acc_ref[...] = jnp.zeros_like(acc_ref)

    # Cast the f32 x tile to bf16 inside the kernel (free VPU filler under the
    # MXU) instead of a separate full-array cast pass over HBM in the wrapper.
    x = x_ref[...].astype(compute_dtype)

    if w_bb_resident:
        off = pl.multiple_of(k * tk, tk)
        w = w_bb_ref[pl.ds(off, tk), :]
    else:
        w = w_bb_ref[...]

    acc_ref[...] += jnp.dot(x, w, preferred_element_type=jnp.float32)

    # Epilogue on the last K step: bias + ReLU (f32), classifier matmul,
    # classifier bias, lane-dense store (C_pad is a multiple of 128).
    @pl.when(k == pl.num_programs(1) - 1)
    def _():
        feats = jnp.maximum(acc_ref[...] + b_bb_ref[...], 0.0)
        logits = jnp.dot(feats.astype(w_cls_ref.dtype), w_cls_ref[...],
                         preferred_element_type=jnp.float32) + b_cls_ref[...]
        out_ref[...] = logits.astype(out_ref.dtype)


def prepare_finetune_params(w_bb, b_bb, w_cls, b_cls, *,
                            compute_dtype=jnp.bfloat16):
    """One-time weight prep: transpose (PyTorch [out,in] -> [in,out]), zero-pad
    to MXU/lane-friendly shapes, cast matmul operands to the compute dtype."""
    feat_dim, d_in = w_bb.shape
    num_class = w_cls.shape[0]

    budget = _tpu_budget()
    tk_max = budget["tk_max"]

    # Choose tk so that x never needs a materialized K pad when d_in is already
    # a multiple of 128 (typical for C*H*W); otherwise pad K once on the weight
    # side and (cheaply) on x.
    if d_in % 128 == 0:
        tk = 128
        t = 128
        while t <= min(d_in, tk_max):
            if d_in % t == 0:
                tk = t
            t += 128
        d_in_pad = d_in
    else:
        tk = min(tk_max, _round_up(d_in, 128))
        d_in_pad = _round_up(d_in, tk)

    f_pad = _round_up(feat_dim, 128)
    c_pad = _round_up(num_class, 128)

    w_bb_t = jnp.zeros((d_in_pad, f_pad), compute_dtype)
    w_bb_t = w_bb_t.at[:d_in, :feat_dim].set(w_bb.T.astype(compute_dtype))

    w_cls_t = jnp.zeros((f_pad, c_pad), compute_dtype)
    w_cls_t = w_cls_t.at[:feat_dim, :num_class].set(w_cls.T.astype(compute_dtype))

    b_bb_p = jnp.zeros((1, f_pad), jnp.float32)
    b_bb_p = b_bb_p.at[0, :feat_dim].set(b_bb.astype(jnp.float32))

    b_cls_p = jnp.zeros((1, c_pad), jnp.float32)
    b_cls_p = b_cls_p.at[0, :num_class].set(b_cls.astype(jnp.float32))

    # Keep w_bb fully VMEM-resident (one DMA for the whole grid) when small
    # enough for this generation's VMEM; otherwise it streams per (i, k) tile.
    w_bb_bytes = d_in_pad * f_pad * jnp.dtype(compute_dtype).itemsize
    w_bb_resident = w_bb_bytes <= budget["resident_w_bb_budget"]

    meta = dict(d_in=d_in, d_in_pad=d_in_pad, tk=tk,
                feat_dim=feat_dim, f_pad=f_pad,
                num_class=num_class, c_pad=c_pad,
                compute_dtype=compute_dtype,
                w_bb_resident=w_bb_resident,
                vmem_limit=budget["vmem_limit"])
    return (w_bb_t, b_bb_p, w_cls_t, b_cls_p), meta


def _pick_tm(B, tm_max=256):
    """Batch tile: sublane-aligned; aim for >= 2 batch tiles when B permits so
    the 'parallel' batch axis can be sharded across both TCs on v7x."""
    if B <= 8:
        tm = 8
    elif B <= 2 * tm_max:
        tm = min(tm_max, _round_up(-(-B // 2), 8))
    else:
        tm = tm_max
    return tm, _round_up(B, tm)


def _make_call(tm, tk, b_pad, d_in_pad, f_pad, c_pad, meta, cost,
               single_buffer_residents):
    kernel = functools.partial(
        _finetune_kernel, tk=tk,
        w_bb_resident=meta["w_bb_resident"],
        compute_dtype=meta["compute_dtype"])

    resident_kwargs = {}
    if single_buffer_residents:
        # Constant index_map => double-buffering buys nothing; single-buffer to
        # save VMEM and a redundant DMA.
        resident_kwargs = dict(pipeline_mode=pl.Buffered(1))

    if meta["w_bb_resident"]:
        w_bb_spec = pl.BlockSpec((d_in_pad, f_pad), lambda i, k: (0, 0),
                                 **resident_kwargs)
    else:
        w_bb_spec = pl.BlockSpec((tk, f_pad), lambda i, k: (k, 0))

    grid = (b_pad // tm, d_in_pad // tk)      # K (reduction) last

    return pl.pallas_call(
        kernel,
        out_shape=jax.ShapeDtypeStruct((b_pad, c_pad), jnp.float32),
        grid_spec=pltpu.PrefetchScalarGridSpec(
            num_scalar_prefetch=0,
            grid=grid,
            in_specs=[
                pl.BlockSpec((tm, tk), lambda i, k: (i, k)),               # x (f32)
                w_bb_spec,                                                  # w_bb
                pl.BlockSpec((1, f_pad), lambda i, k: (0, 0),
                             **resident_kwargs),                           # b_bb
                pl.BlockSpec((f_pad, c_pad), lambda i, k: (0, 0),
                             **resident_kwargs),                           # w_cls
                pl.BlockSpec((1, c_pad), lambda i, k: (0, 0),
                             **resident_kwargs),                           # b_cls
            ],
            out_specs=pl.BlockSpec((tm, c_pad), lambda i, k: (i, 0)),
            scratch_shapes=[pltpu.VMEM((tm, f_pad), jnp.float32)],
        ),
        compiler_params=pltpu.CompilerParams(
            dimension_semantics=("parallel", "arbitrary"),
            vmem_limit_bytes=meta["vmem_limit"],
        ),
        cost_estimate=cost,
    )


def finetune_forward(x_nchw, params, meta, *, tm_max=256):
    """x_nchw: [B, C, H, W] float32.  Returns logits [B, num_class] (f32)."""
    w_bb_t, b_bb_p, w_cls_t, b_cls_p = params
    d_in, d_in_pad, tk = meta["d_in"], meta["d_in_pad"], meta["tk"]
    f_pad, c_pad = meta["f_pad"], meta["c_pad"]
    num_class, feat_dim = meta["num_class"], meta["feat_dim"]

    B = x_nchw.shape[0]
    # Flatten only (free reshape); x stays f32 in HBM, bf16 cast happens in-kernel.
    x_flat = x_nchw.reshape(B, -1)
    assert x_flat.shape[1] == d_in

    tm, b_pad = _pick_tm(B, tm_max)
    if b_pad != B or d_in_pad != d_in:
        # Only materialized when shapes are not already tile-aligned.
        x_flat = jnp.pad(x_flat, ((0, b_pad - B), (0, d_in_pad - d_in)))

    flops = 2 * B * d_in * feat_dim + 2 * B * feat_dim * num_class
    bytes_accessed = (x_flat.size * x_flat.dtype.itemsize
                      + w_bb_t.size * w_bb_t.dtype.itemsize
                      + w_cls_t.size * w_cls_t.dtype.itemsize
                      + b_bb_p.size * 4 + b_cls_p.size * 4
                      + b_pad * c_pad * 4)
    cost = pl.CostEstimate(flops=flops, transcendentals=0,
                           bytes_accessed=bytes_accessed)

    args = (x_flat, w_bb_t, b_bb_p, w_cls_t, b_cls_p)
    try:
        out_padded = _make_call(tm, tk, b_pad, d_in_pad, f_pad, c_pad, meta,
                                cost, single_buffer_residents=True)(*args)
    except Exception:
        # Fallback if pl.Buffered(1) single-buffering is rejected on this build.
        out_padded = _make_call(tm, tk, b_pad, d_in_pad, f_pad, c_pad, meta,
                                cost, single_buffer_residents=False)(*args)

    return out_padded[:B, :num_class]          # strip padding


def _reference_forward(x_nchw, w_bb, b_bb, w_cls, b_cls,
                       compute_dtype=jnp.bfloat16):
    """Plain-JAX reference using the same bf16-matmul / f32-accumulate recipe."""
    x_flat = x_nchw.reshape(x_nchw.shape[0], -1).astype(compute_dtype)
    feats = jnp.dot(x_flat, w_bb.T.astype(compute_dtype),
                    preferred_element_type=jnp.float32) + b_bb
    feats = jnp.maximum(feats, 0.0)
    return jnp.dot(feats.astype(compute_dtype), w_cls.T.astype(compute_dtype),
                   preferred_element_type=jnp.float32) + b_cls


if __name__ == "__main__":
    # Small deterministic shapes consistent with the module's forward:
    #   image x: [B=2, C=4, H=16, W=16], feat_dim=32, num_class=10
    B, C, H, W = 2, 4, 16, 16
    feat_dim, num_class = 32, 10
    d_in = C * H * W

    key = jax.random.PRNGKey(0)
    kx, k1, k2, k3, k4 = jax.random.split(key, 5)

    x = jax.random.normal(kx, (B, C, H, W), dtype=jnp.float32)

    # Deterministic parameter init (uniform, PyTorch-Linear-like scaling).
    bound_bb = 1.0 / jnp.sqrt(d_in)
    w_bb = jax.random.uniform(k1, (feat_dim, d_in), jnp.float32, -bound_bb, bound_bb)
    b_bb = jax.random.uniform(k2, (feat_dim,), jnp.float32, -bound_bb, bound_bb)

    bound_cls = 1.0 / jnp.sqrt(feat_dim)
    w_cls = jax.random.uniform(k3, (num_class, feat_dim), jnp.float32,
                               -bound_cls, bound_cls)
    b_cls = jax.random.uniform(k4, (num_class,), jnp.float32, -bound_cls, bound_cls)

    # Weight prep happens once (transpose/pad/cast), not per forward call.
    params, meta = prepare_finetune_params(w_bb, b_bb, w_cls, b_cls)

    logits = finetune_forward(x, params, meta)
    jax.block_until_ready(logits)

    # Correctness check against a plain-JAX reference using the same bf16 recipe.
    ref = _reference_forward(x, w_bb, b_bb, w_cls, b_cls)
    assert logits.shape == (B, num_class)
    assert jnp.allclose(logits, ref, atol=1e-2, rtol=1e-2), (
        float(jnp.max(jnp.abs(logits - ref))))

    print("KERNEL_OK")
</pallas_src>

<mosaic_0001>
module attributes {stable_mosaic.version = 11 : i64} {
  func.func @_finetune_kernel(%arg0: i32, %arg1: i32, %arg2: memref<8x1024xf32, #tpu.memory_space<vmem>>, %arg3: memref<1024x128xbf16, #tpu.memory_space<vmem>>, %arg4: memref<1x128xf32, #tpu.memory_space<vmem>>, %arg5: memref<128x128xbf16, #tpu.memory_space<vmem>>, %arg6: memref<1x128xf32, #tpu.memory_space<vmem>>, %arg7: memref<8x128xf32, #tpu.memory_space<vmem>>, %arg8: memref<8x128xf32, #tpu.memory_space<vmem>>) attributes {dimension_semantics = [#tpu.dimension_semantics<parallel>, #tpu.dimension_semantics<arbitrary>], iteration_bounds = array<i64: 1, 1>, scalar_prefetch = 0 : i64, scratch_operands = 1 : i64, tpu.core_type = #tpu.core_type<tc>, window_params = [{transform_indices = @transform_0, window_bounds = array<i64: 8, 1024>}, {pipeline_mode = #tpu.pipeline_mode<synchronous>, transform_indices = @transform_1, window_bounds = array<i64: 1024, 128>}, {pipeline_mode = #tpu.pipeline_mode<synchronous>, transform_indices = @transform_2, window_bounds = array<i64: 1, 128>}, {pipeline_mode = #tpu.pipeline_mode<synchronous>, transform_indices = @transform_3, window_bounds = array<i64: 128, 128>}, {pipeline_mode = #tpu.pipeline_mode<synchronous>, transform_indices = @transform_4, window_bounds = array<i64: 1, 128>}, {transform_indices = @transform_5, window_bounds = array<i64: 8, 128>}]} {
    %c0_i32 = arith.constant 0 : i32
    %0 = arith.cmpi eq, %arg1, %c0_i32 : i32
    %1 = arith.extui %0 : i1 to i32
    %c0_i32_0 = arith.constant 0 : i32
    %2 = arith.cmpi ne, %1, %c0_i32_0 : i32
    scf.if %2 {
      %cst_9 = arith.constant 0.000000e+00 : f32
      %16 = vector.broadcast %cst_9 : f32 to vector<8x128xf32>
      %c0_10 = arith.constant 0 : index
      %c0_11 = arith.constant 0 : index
      %17 = vector.load %arg8[%c0_10, %c0_11] : memref<8x128xf32, #tpu.memory_space<vmem>>, vector<8x128xf32>
      tpu.vector_store %arg8[%c0_10, %c0_11], %16 {strides = array<i32>} : memref<8x128xf32, #tpu.memory_space<vmem>>, vector<8x128xf32>,
    } else {
    }
    %c0 = arith.constant 0 : index
    %c0_1 = arith.constant 0 : index
    %3 = vector.load %arg2[%c0, %c0_1] : memref<8x1024xf32, #tpu.memory_space<vmem>>, vector<8x1024xf32>
    %4 = arith.truncf %3 : vector<8x1024xf32> to vector<8x1024xbf16>
    %c1024_i32 = arith.constant 1024 : i32
    %5 = arith.muli %arg1, %c1024_i32 : i32
    %6 = tpu.assume_multiple %5, 1024 : i32
    %7 = arith.index_cast %6 : i32 to index
    %c0_2 = arith.constant 0 : index
    %8 = vector.load %arg3[%7, %c0_2] : memref<1024x128xbf16, #tpu.memory_space<vmem>>, vector<1024x128xbf16>
    %c0_3 = arith.constant 0 : index
    %c0_4 = arith.constant 0 : index
    %9 = vector.load %arg8[%c0_3, %c0_4] : memref<8x128xf32, #tpu.memory_space<vmem>>, vector<8x128xf32>
    %cst = arith.constant dense<0.000000e+00> : vector<8x128xf32>
    %10 = tpu.matmul %4, %8, %cst {dimension_numbers = #tpu.dot_dimension_numbers<[1], [0], [0], [1], [0, 0, 1, 1], [], []>} : vector<8x1024xbf16>, vector<1024x128xbf16>, vector<8x128xf32> -> vector<8x128xf32>
    %11 = arith.addf %9, %10 : vector<8x128xf32>
    %c0_5 = arith.constant 0 : index
    %c0_6 = arith.constant 0 : index
    %12 = vector.load %arg8[%c0_5, %c0_6] : memref<8x128xf32, #tpu.memory_space<vmem>>, vector<8x128xf32>
    tpu.vector_store %arg8[%c0_5, %c0_6], %11 {strides = array<i32>} : memref<8x128xf32, #tpu.memory_space<vmem>>, vector<8x128xf32>,
    %c0_i32_7 = arith.constant 0 : i32
    %13 = arith.cmpi eq, %arg1, %c0_i32_7 : i32
    %14 = arith.extui %13 : i1 to i32
    %c0_i32_8 = arith.constant 0 : i32
    %15 = arith.cmpi ne, %14, %c0_i32_8 : i32
    scf.if %15 {
      %c0_9 = arith.constant 0 : index
      %c0_10 = arith.constant 0 : index
      %16 = vector.load %arg8[%c0_9, %c0_10] : memref<8x128xf32, #tpu.memory_space<vmem>>, vector<8x128xf32>
      %c0_11 = arith.constant 0 : index
      %c0_12 = arith.constant 0 : index
      %17 = vector.load %arg4[%c0_11, %c0_12] : memref<1x128xf32, #tpu.memory_space<vmem>>, vector<1x128xf32>
      %18 = vector.broadcast %17 : vector<1x128xf32> to vector<8x128xf32>
      %19 = arith.addf %16, %18 : vector<8x128xf32>
      %cst_13 = arith.constant 0.000000e+00 : f32
      %20 = vector.broadcast %cst_13 : f32 to vector<8x128xf32>
      %21 = arith.maximumf %19, %20 : vector<8x128xf32>
      %22 = arith.truncf %21 : vector<8x128xf32> to vector<8x128xbf16>
      %c0_14 = arith.constant 0 : index
      %c0_15 = arith.constant 0 : index
      %23 = vector.load %arg5[%c0_14, %c0_15] : memref<128x128xbf16, #tpu.memory_space<vmem>>, vector<128x128xbf16>
      %cst_16 = arith.constant dense<0.000000e+00> : vector<8x128xf32>
      %24 = tpu.matmul %22, %23, %cst_16 {dimension_numbers = #tpu.dot_dimension_numbers<[1], [0], [0], [1], [0, 0, 1, 1], [], []>} : vector<8x128xbf16>, vector<128x128xbf16>, vector<8x128xf32> -> vector<8x128xf32>
      %c0_17 = arith.constant 0 : index
      %c0_18 = arith.constant 0 : index
      %25 = vector.load %arg6[%c0_17, %c0_18] : memref<1x128xf32, #tpu.memory_space<vmem>>, vector<1x128xf32>
      %26 = vector.broadcast %25 : vector<1x128xf32> to vector<8x128xf32>
      %27 = arith.addf %24, %26 : vector<8x128xf32>
      %c0_19 = arith.constant 0 : index
      %c0_20 = arith.constant 0 : index
      %28 = vector.load %arg7[%c0_19, %c0_20] : memref<8x128xf32, #tpu.memory_space<vmem>>, vector<8x128xf32>
      tpu.vector_store %arg7[%c0_19, %c0_20], %27 {strides = array<i32>} : memref<8x128xf32, #tpu.memory_space<vmem>>, vector<8x128xf32>,
    } else {
    }
    return
  }
  func.func @transform_0(%arg0: i32, %arg1: i32) -> (i32, i32) {
    %c0_i32 = arith.constant 0 : i32
    return %arg0, %arg1 : i32, i32
  }
  func.func @transform_1(%arg0: i32, %arg1: i32) -> (i32, i32) {
    %c0_i32 = arith.constant 0 : i32
    %c0_i32_0 = arith.constant 0 : i32
    %c0_i32_1 = arith.constant 0 : i32
    return %c0_i32, %c0_i32_0 : i32, i32
  }
  func.func @transform_2(%arg0: i32, %arg1: i32) -> (i32, i32) {
    %c0_i32 = arith.constant 0 : i32
    %c0_i32_0 = arith.constant 0 : i32
    %c0_i32_1 = arith.constant 0 : i32
    return %c0_i32, %c0_i32_0 : i32, i32
  }
  func.func @transform_3(%arg0: i32, %arg1: i32) -> (i32, i32) {
    %c0_i32 = arith.constant 0 : i32
    %c0_i32_0 = arith.constant 0 : i32
    %c0_i32_1 = arith.constant 0 : i32
    return %c0_i32, %c0_i32_0 : i32, i32
  }
  func.func @transform_4(%arg0: i32, %arg1: i32) -> (i32, i32) {
    %c0_i32 = arith.constant 0 : i32
    %c0_i32_0 = arith.constant 0 : i32
    %c0_i32_1 = arith.constant 0 : i32
    return %c0_i32, %c0_i32_0 : i32, i32
  }
  func.func @transform_5(%arg0: i32, %arg1: i32) -> (i32, i32) {
    %c0_i32 = arith.constant 0 : i32
    %c0_i32_0 = arith.constant 0 : i32
    return %arg0, %c0_i32 : i32, i32
  }
}

module attributes {stable_mosaic.version = 11 : i64} {
  func.func @_finetune_kernel(%arg0: i32, %arg1: i32, %arg2: memref<8x1024xf32, #tpu.memory_space<vmem>>, %arg3: memref<1024x128xbf16, #tpu.memory_space<vmem>>, %arg4: memref<1x128xf32, #tpu.memory_space<vmem>>, %arg5: memref<128x128xbf16, #tpu.memory_space<vmem>>, %arg6: memref<1x128xf32, #tpu.memory_space<vmem>>, %arg7: memref<8x128xf32, #tpu.memory_space<vmem>>, %arg8: memref<8x128xf32, #tpu.memory_space<vmem>>) attributes {dimension_semantics = [#tpu.dimension_semantics<parallel>, #tpu.dimension_semantics<arbitrary>], iteration_bounds = array<i64: 1, 1>, scalar_prefetch = 0 : i64, scratch_operands = 1 : i64, tpu.core_type = #tpu.core_type<tc>, window_params = [{transform_indices = @transform_0, window_bounds = array<i64: 8, 1024>}, {pipeline_mode = #tpu.pipeline_mode<synchronous>, transform_indices = @transform_1, window_bounds = array<i64: 1024, 128>}, {pipeline_mode = #tpu.pipeline_mode<synchronous>, transform_indices = @transform_2, window_bounds = array<i64: 1, 128>}, {pipeline_mode = #tpu.pipeline_mode<synchronous>, transform_indices = @transform_3, window_bounds = array<i64: 128, 128>}, {pipeline_mode = #tpu.pipeline_mode<synchronous>, transform_indices = @transform_4, window_bounds = array<i64: 1, 128>}, {transform_indices = @transform_5, window_bounds = array<i64: 8, 128>}]} {
    %c0_i32 = arith.constant 0 : i32
    %0 = arith.cmpi eq, %arg1, %c0_i32 : i32
    %1 = arith.extui %0 : i1 to i32
    %c0_i32_0 = arith.constant 0 : i32
    %2 = arith.cmpi ne, %1, %c0_i32_0 : i32
    scf.if %2 {
      %cst_9 = arith.constant 0.000000e+00 : f32
      %16 = vector.broadcast %cst_9 : f32 to vector<8x128xf32>
      %c0_10 = arith.constant 0 : index
      %c0_11 = arith.constant 0 : index
      %17 = vector.load %arg8[%c0_10, %c0_11] : memref<8x128xf32, #tpu.memory_space<vmem>>, vector<8x128xf32>
      tpu.vector_store %arg8[%c0_10, %c0_11], %16 {strides = array<i32>} : memref<8x128xf32, #tpu.memory_space<vmem>>, vector<8x128xf32>,
    } else {
    }
    %c0 = arith.constant 0 : index
    %c0_1 = arith.constant 0 : index
    %3 = vector.load %arg2[%c0, %c0_1] : memref<8x1024xf32, #tpu.memory_space<vmem>>, vector<8x1024xf32>
    %4 = arith.truncf %3 : vector<8x1024xf32> to vector<8x1024xbf16>
    %c1024_i32 = arith.constant 1024 : i32
    %5 = arith.muli %arg1, %c1024_i32 : i32
    %6 = tpu.assume_multiple %5, 1024 : i32
    %7 = arith.index_cast %6 : i32 to index
    %c0_2 = arith.constant 0 : index
    %8 = vector.load %arg3[%7, %c0_2] : memref<1024x128xbf16, #tpu.memory_space<vmem>>, vector<1024x128xbf16>
    %c0_3 = arith.constant 0 : index
    %c0_4 = arith.constant 0 : index
    %9 = vector.load %arg8[%c0_3, %c0_4] : memref<8x128xf32, #tpu.memory_space<vmem>>, vector<8x128xf32>
    %cst = arith.constant dense<0.000000e+00> : vector<8x128xf32>
    %10 = tpu.matmul %4, %8, %cst {dimension_numbers = #tpu.dot_dimension_numbers<[1], [0], [0], [1], [0, 0, 1, 1], [], []>} : vector<8x1024xbf16>, vector<1024x128xbf16>, vector<8x128xf32> -> vector<8x128xf32>
    %11 = arith.addf %9, %10 : vector<8x128xf32>
    %c0_5 = arith.constant 0 : index
    %c0_6 = arith.constant 0 : index
    %12 = vector.load %arg8[%c0_5, %c0_6] : memref<8x128xf32, #tpu.memory_space<vmem>>, vector<8x128xf32>
    tpu.vector_store %arg8[%c0_5, %c0_6], %11 {strides = array<i32>} : memref<8x128xf32, #tpu.memory_space<vmem>>, vector<8x128xf32>,
    %c0_i32_7 = arith.constant 0 : i32
    %13 = arith.cmpi eq, %arg1, %c0_i32_7 : i32
    %14 = arith.extui %13 : i1 to i32
    %c0_i32_8 = arith.constant 0 : i32
    %15 = arith.cmpi ne, %14, %c0_i32_8 : i32
    scf.if %15 {
      %c0_9 = arith.constant 0 : index
      %c0_10 = arith.constant 0 : index
      %16 = vector.load %arg8[%c0_9, %c0_10] : memref<8x128xf32, #tpu.memory_space<vmem>>, vector<8x128xf32>
      %c0_11 = arith.constant 0 : index
      %c0_12 = arith.constant 0 : index
      %17 = vector.load %arg4[%c0_11, %c0_12] : memref<1x128xf32, #tpu.memory_space<vmem>>, vector<1x128xf32>
      %18 = vector.broadcast %17 : vector<1x128xf32> to vector<8x128xf32>
      %19 = arith.addf %16, %18 : vector<8x128xf32>
      %cst_13 = arith.constant 0.000000e+00 : f32
      %20 = vector.broadcast %cst_13 : f32 to vector<8x128xf32>
      %21 = arith.maximumf %19, %20 : vector<8x128xf32>
      %22 = arith.truncf %21 : vector<8x128xf32> to vector<8x128xbf16>
      %c0_14 = arith.constant 0 : index
      %c0_15 = arith.constant 0 : index
      %23 = vector.load %arg5[%c0_14, %c0_15] : memref<128x128xbf16, #tpu.memory_space<vmem>>, vector<128x128xbf16>
      %cst_16 = arith.constant dense<0.000000e+00> : vector<8x128xf32>
      %24 = tpu.matmul %22, %23, %cst_16 {dimension_numbers = #tpu.dot_dimension_numbers<[1], [0], [0], [1], [0, 0, 1, 1], [], []>} : vector<8x128xbf16>, vector<128x128xbf16>, vector<8x128xf32> -> vector<8x128xf32>
      %c0_17 = arith.constant 0 : index
      %c0_18 = arith.constant 0 : index
      %25 = vector.load %arg6[%c0_17, %c0_18] : memref<1x128xf32, #tpu.memory_space<vmem>>, vector<1x128xf32>
      %26 = vector.broadcast %25 : vector<1x128xf32> to vector<8x128xf32>
      %27 = arith.addf %24, %26 : vector<8x128xf32>
      %c0_19 = arith.constant 0 : index
      %c0_20 = arith.constant 0 : index
      %28 = vector.load %arg7[%c0_19, %c0_20] : memref<8x128xf32, #tpu.memory_space<vmem>>, vector<8x128xf32>
      tpu.vector_store %arg7[%c0_19, %c0_20], %27 {strides = array<i32>} : memref<8x128xf32, #tpu.memory_space<vmem>>, vector<8x128xf32>,
    } else {
    }
    return
  }
  func.func @transform_0(%arg0: i32, %arg1: i32) -> (i32, i32) {
    %c0_i32 = arith.constant 0 : i32
    return %arg0, %arg1 : i32, i32
  }
  func.func @transform_1(%arg0: i32, %arg1: i32) -> (i32, i32) {
    %c0_i32 = arith.constant 0 : i32
    %c0_i32_0 = arith.constant 0 : i32
    %c0_i32_1 = arith.constant 0 : i32
    return %c0_i32, %c0_i32_0 : i32, i32
  }
  func.func @transform_2(%arg0: i32, %arg1: i32) -> (i32, i32) {
    %c0_i32 = arith.constant 0 : i32
    %c0_i32_0 = arith.constant 0 : i32
    %c0_i32_1 = arith.constant 0 : i32
    return %c0_i32, %c0_i32_0 : i32, i32
  }
  func.func @transform_3(%arg0: i32, %arg1: i32) -> (i32, i32) {
    %c0_i32 = arith.constant 0 : i32
    %c0_i32_0 = arith.constant 0 : i32
    %c0_i32_1 = arith.constant 0 : i32
    return %c0_i32, %c0_i32_0 : i32, i32
  }
  func.func @transform_4(%arg0: i32, %arg1: i32) -> (i32, i32) {
    %c0_i32 = arith.constant 0 : i32
    %c0_i32_0 = arith.constant 0 : i32
    %c0_i32_1 = arith.constant 0 : i32
    return %c0_i32, %c0_i32_0 : i32, i32
  }
  func.func @transform_5(%arg0: i32, %arg1: i32) -> (i32, i32) {
    %c0_i32 = arith.constant 0 : i32
    %c0_i32_0 = arith.constant 0 : i32
    return %arg0, %c0_i32 : i32, i32
  }
}

</mosaic_0001>

<bundles_post_ra>
// kernel: tpu_custom_call.1
= control target key start
LH: loop header
LB: loop body
LE: loop exit
PB: predicated region body
PF: predicated region fallthrough
CT: control target
= control target key end

     0   :  { %10 = vsyncpa [#allocation4], 0  ;;  %s1369_s0 = inlined_call_operand.hbm [shape: f32[8,1024], index: 0, kind: input, shape index: {}]   ;;  %s1370_s1 = inlined_call_operand.hbm [shape: bf16[1024,128], index: 1, kind: input, shape index: {}]   ;;  %s1371_s2 = inlined_call_operand.vmem [shape: f32[1,128], index: 2, kind: input, shape index: {}]   ;;  %s1372_s3 = inlined_call_operand.hbm [shape: bf16[128,128], index: 3, kind: input, shape index: {}]   ;;  %s1373_s4 = inlined_call_operand.vmem [shape: f32[1,128], index: 4, kind: input, shape index: {}]   ;;  %s1374_s5 = inlined_call_operand.hbm [shape: f32[8,128], index: 5, kind: output, shape index: {}]  }
   0x1   :  { %11 = vsyncpa [#allocation7], 0 }
   0x2   :  { %12 = vsyncpa [#allocation5], 0  ;;  %s1271_s18 = smov [#allocation6]   ;;  %s1177_s22 = scalar_lea.hbm %s1370_s1, 8192 }
   0x3   :  { %s28_s19 = sshll.u32 %s1271_s18, 4  ;;  %p1178_p0 = scmp.ne.s32.totalorder %s1370_s1, %s1177_s22  ;;  %s29_s19 = int_to_ptr.vmem [resolvable:$true] %s28_s19 }
   0x4   :  { %p1181_p1 = scmp.lt.u32.totalorder %s1177_s22, %s1370_s1 }
   0x6   :  { %p1183_p2 = pnand %p1181_p1, %p1178_p0 }
   0x8   :  { %1186 = shalt.err (!%p1183_p2)
}
   0x9   :  { %s1187_s27 = scalar_lea.vmem %s29_s19, 8192  ;;  %p1192_p4 = scmp.lt.s32.totalorder %s29_s19, %s29_s19 }
   0xa   :  { %p1188_p3 = scmp.ne.s32.totalorder %s29_s19, %s1187_s27  ;;  %p1193_p5 = scmp.lt.s32.totalorder %s1187_s27, %s1187_s27 }
   0xc   :  { %p1194_p6 = por %p1193_p5, %p1192_p4 }
   0xe   :  { %p1195_p7 = pnand %p1194_p6, %p1188_p3 }
  0x10   :  { %1198 = shalt.err (!%p1195_p7)
}
  0x11   :  { %s1272_s28 = smov 64   ;;  %s1273_s29 = smov 4  }
  0x12   :  { %34 = dma.hbm_to_vmem [thread:$0]  %s1370_s1, 8192, %s29_s19, [#allocation7], %s1272_s28, %s1272_s28, %s1273_s29  }
  0x13   :  { %s1274_s7 = smov [#allocation3]   ;;  %s1275_s9 = smov [#allocation8]  }
  0x14   :  { %s19_s8 = sshll.u32 %s1274_s7, 4  ;;  %s42_s10 = sshll.u32 %s1275_s9, 4  ;;  %s20_s8 = int_to_ptr.vmem [resolvable:$true] %s19_s8  ;;  %s43_s10 = int_to_ptr.vmem [resolvable:$true] %s42_s10 }
  0x15   :  { %s1199_s13 = scalar_lea.hbm %s1369_s0, 1024 }
  0x16   :  { %p1200_p8 = scmp.ne.s32.totalorder %s1369_s0, %s1199_s13  ;;  %p1203_p9 = scmp.lt.u32.totalorder %s1199_s13, %s1369_s0 }
  0x18   :  { %p1205_p10 = pnand %p1203_p9, %p1200_p8 }
  0x1a   :  { %1208 = shalt.err (!%p1205_p10)
}
  0x1b   :  { %s1209_s1 = scalar_lea.vmem %s20_s8, 1024  ;;  %p1214_p12 = scmp.lt.s32.totalorder %s20_s8, %s20_s8 }
  0x1c   :  { %p1210_p11 = scmp.ne.s32.totalorder %s20_s8, %s1209_s1  ;;  %p1215_p13 = scmp.lt.s32.totalorder %s1209_s1, %s1209_s1 }
  0x1e   :  { %p1216_p0 = por %p1215_p13, %p1214_p12 }
  0x20   :  { %p1217_p1 = pnand %p1216_p0, %p1210_p11 }
  0x22   :  { %1220 = shalt.err (!%p1217_p1)
}
  0x23   :  { %22 = dma.hbm_to_vmem [thread:$0]  %s1369_s0, 1024, %s20_s8, [#allocation4]  }
  0x24   :  { %s1221_s22 = scalar_lea.hbm %s1372_s3, 1024 }
  0x25   :  { %p1222_p2 = scmp.ne.s32.totalorder %s1372_s3, %s1221_s22  ;;  %p1225_p3 = scmp.lt.u32.totalorder %s1221_s22, %s1372_s3 }
  0x27   :  { %p1227_p4 = pnand %p1225_p3, %p1222_p2 }
  0x29   :  { %1230 = shalt.err (!%p1227_p4)
}
  0x2a   :  { %s1231_s27 = scalar_lea.vmem %s43_s10, 1024  ;;  %p1236_p6 = scmp.lt.s32.totalorder %s43_s10, %s43_s10 }
  0x2b   :  { %p1232_p5 = scmp.ne.s32.totalorder %s43_s10, %s1231_s27  ;;  %p1237_p7 = scmp.lt.s32.totalorder %s1231_s27, %s1231_s27 }
  0x2d   :  { %p1238_p8 = por %p1237_p7, %p1236_p6 }
  0x2f   :  { %p1239_p9 = pnand %p1238_p8, %p1232_p5 }
  0x31   :  { %1242 = shalt.err (!%p1239_p9)
}
  0x32   :  { %48 = dma.hbm_to_vmem [thread:$0]  %s1372_s3, 1024, %s43_s10, [#allocation7], %s1272_s28, %s1272_s28, %s1273_s29  }
  0x33   :  { %1265 = dma.done.wait [#allocation4], 1024  }
  0x34   :  { %1266 = vsyncadd [#allocation4], 4294966272 }
  0x35   :  { %1267 = dma.done.wait [#allocation7], 9216  }
  0x36   :  { %1268 = vsyncadd [#allocation7], 4294958080  ;;  %v1105_v0 = vld [vmem:[#allocation6 + $0x40] sm:$0xff]   ;;  %v1109_v4 = vld [vmem:[#allocation6 + $0x48] sm:$0xff]   ;;  %vm1277_vm0 = vmmov 0   ;;  %s1278_s7 = smov [#allocation9]  }
  0x37   :  { %v1106_v1 = vld [vmem:[#allocation6 + $0xc0] sm:$0xff]   ;;  %980 = vmatprep.subr.bf16.mxu0 %v1105_v0  ;;  %v1110_v5 = vld [vmem:[#allocation6 + $0xc8] sm:$0xff]   ;;  %v1113_v8 = vld [vmem:[#allocation6 + $0x50] sm:$0xff]   ;;  %s894_s8 = sshll.u32 %s1278_s7, 4  ;;  %s895_s8 = int_to_ptr.vmem [resolvable:$true] %s894_s8 }
  0x38   :  { %v1107_v2 = vld [vmem:[#allocation6] sm:$0xff]   ;;  %1002 = vmatprep.subr.bf16.mxu1 %v1106_v1  ;;  %v1111_v6 = vld [vmem:[#allocation6 + $0x8] sm:$0xff]   ;;  %v1114_v9 = vld [vmem:[#allocation6 + $0xd0] sm:$0xff]   ;;  %s1243_s9 = scalar_lea.vmem %s895_s8, 128  ;;  %p1248_p11 = scmp.lt.s32.totalorder %s895_s8, %s895_s8 }
  0x39   :  { %v1108_v3 = vld [vmem:[#allocation6 + $0x80] sm:$0xff]   ;;  %981 = vmatpush3.bf16.msra.mxu0 %v1107_v2  ;;  %v1112_v7 = vld [vmem:[#allocation6 + $0x88] sm:$0xff]   ;;  %v1115_v10 = vld [vmem:[#allocation6 + $0x10] sm:$0xff]   ;;  %p1244_p10 = scmp.ne.s32.totalorder %s895_s8, %s1243_s9  ;;  %p1249_p12 = scmp.lt.s32.totalorder %s1243_s9, %s1243_s9 }
  0x3a   :  { %1003 = vmatpush3.bf16.msra.mxu1 %v1108_v3  ;;  %982 = vmatprep.subr.bf16.mxu0 %v1109_v4  ;;  %v1116_v11 = vld [vmem:[#allocation6 + $0x90] sm:$0xff]   ;;  %v1117_v12 = vld [vmem:[#allocation6 + $0x58] sm:$0xff]   ;;  %v1121_v16 = vld [vmem:[#allocation6 + $0x60] sm:$0xff]  }
  0x3b   :  { %1004 = vmatprep.subr.bf16.mxu1 %v1110_v5  ;;  %v1118_v13 = vld [vmem:[#allocation6 + $0xd8] sm:$0xff]   ;;  %v1122_v17 = vld [vmem:[#allocation6 + $0xe0] sm:$0xff]   ;;  %v1125_v20 = vld [vmem:[#allocation6 + $0x68] sm:$0xff]   ;;  %p1250_p13 = por %p1249_p12, %p1248_p11 }
  0x3c   :  { %v1119_v14 = vld [vmem:[#allocation6 + $0x18] sm:$0xff]   ;;  %v1123_v18 = vld [vmem:[#allocation6 + $0x20] sm:$0xff]   ;;  %v1126_v21 = vld [vmem:[#allocation6 + $0xe8] sm:$0xff]  }
  0x3d   :  { %983 = vmatpush3.bf16.msra.mxu0 %v1111_v6  ;;  %v1120_v15 = vld [vmem:[#allocation6 + $0x98] sm:$0xff]   ;;  %v1124_v19 = vld [vmem:[#allocation6 + $0xa0] sm:$0xff]   ;;  %v1127_v22 = vld [vmem:[#allocation6 + $0x28] sm:$0xff]   ;;  %p1251_p0 = pnand %p1250_p13, %p1244_p10 }
  0x3e   :  { %1005 = vmatpush3.bf16.msra.mxu1 %v1112_v7  ;;  %984 = vmatprep.subr.bf16.mxu0 %v1113_v8  ;;  %v1128_v23 = vld [vmem:[#allocation6 + $0xa8] sm:$0xff]   ;;  %v1129_v24 = vld [vmem:[#allocation6 + $0x70] sm:$0xff]   ;;  %v1133_v28 = vld [vmem:[#allocation6 + $0x78] sm:$0xff]  }
  0x3f   :  { %1006 = vmatprep.subr.bf16.mxu1 %v1114_v9  ;;  %v1130_v25 = vld [vmem:[#allocation6 + $0xf0] sm:$0xff]   ;;  %v1134_v29 = vld [vmem:[#allocation6 + $0xf8] sm:$0xff]   ;;  %v67_v32 = vld [vmem:[#allocation3 + $0x8] sm:$0xff] }
  0x40   :  { %v1131_v26 = vld [vmem:[#allocation6 + $0x30] sm:$0xff]   ;;  %v1135_v30 = vld [vmem:[#allocation6 + $0x38] sm:$0xff]   ;;  %v66_v34 = vld [vmem:[#allocation3] sm:$0xff]  ;;  %v75_v35 = vpack.c.bf16 %v67_v32, %v67_v32 }
  0x41   :  { %985 = vmatpush3.bf16.msra.mxu0 %v1115_v10  ;;  %v1132_v27 = vld [vmem:[#allocation6 + $0xb0] sm:$0xff]   ;;  %v1136_v31 = vld [vmem:[#allocation6 + $0xb8] sm:$0xff]   ;;  %v74_v37 = vpack.c.bf16 %v66_v34, %v66_v34  ;;  %v1137_v40 = vld [vmem:[#allocation6 + $0x140] sm:$0xff]  }
  0x42   :  { %1007 = vmatpush3.bf16.msra.mxu1 %v1116_v11  ;;  %986 = vmatprep.subr.bf16.mxu0 %v1117_v12  ;;  %v69_v33 = vld [vmem:[#allocation3 + $0x18] sm:$0xff]  ;;  %v68_v38 = vld [vmem:[#allocation3 + $0x10] sm:$0xff]  ;;  %v1138_v41 = vld [vmem:[#allocation6 + $0x1c0] sm:$0xff]  }
  0x43   :  { %1008 = vmatprep.subr.bf16.mxu1 %v1118_v13  ;;  %v77_v36 = vpack.c.bf16 %v69_v33, %v69_v33  ;;  %v76_v39 = vpack.c.bf16 %v68_v38, %v68_v38  ;;  %632 = vmatprep.mubr.bf16.mxu0 %v75_v35  ;;  %v1139_v42 = vld [vmem:[#allocation6 + $0x100] sm:$0xff]   ;;  %v1141_v44 = vld [vmem:[#allocation6 + $0x148] sm:$0xff]   ;;  %v1145_v48 = vld [vmem:[#allocation6 + $0x150] sm:$0xff]  }
  0x44   :  { %v1140_v43 = vld [vmem:[#allocation6 + $0x180] sm:$0xff]   ;;  %v1142_v45 = vld [vmem:[#allocation6 + $0x1c8] sm:$0xff]   ;;  %v1146_v49 = vld [vmem:[#allocation6 + $0x1d0] sm:$0xff]  }
  0x45   :  { %987 = vmatpush3.bf16.msra.mxu0 %v1119_v14  ;;  %672 = vmatprep.mubr.bf16.mxu1 %v77_v36  ;;  %v1143_v46 = vld [vmem:[#allocation6 + $0x108] sm:$0xff]   ;;  %v1147_v50 = vld [vmem:[#allocation6 + $0x110] sm:$0xff]   ;;  %v1149_v52 = vld [vmem:[#allocation6 + $0x158] sm:$0xff]  }
  0x46   :  { %1009 = vmatpush3.bf16.msra.mxu1 %v1120_v15  ;;  %988 = vmatprep.subr.bf16.mxu0 %v1121_v16  ;;  %v1144_v47 = vld [vmem:[#allocation6 + $0x188] sm:$0xff]   ;;  %v1148_v51 = vld [vmem:[#allocation6 + $0x190] sm:$0xff]   ;;  %v1150_v53 = vld [vmem:[#allocation6 + $0x1d8] sm:$0xff]  }
  0x47   :  { %1010 = vmatprep.subr.bf16.mxu1 %v1122_v17  ;;  %v1151_v54 = vld [vmem:[#allocation6 + $0x118] sm:$0xff]   ;;  %v1153_v56 = vld [vmem:[#allocation6 + $0x160] sm:$0xff]   ;;  %v1157_v60 = vld [vmem:[#allocation6 + $0x168] sm:$0xff]   ;;  %v1276_v17 = vmov 0.0  }
  0x48   :  { %v1152_v55 = vld [vmem:[#allocation6 + $0x198] sm:$0xff]   ;;  %v1154_v57 = vld [vmem:[#allocation6 + $0x1e0] sm:$0xff]   ;;  %v1158_v61 = vld [vmem:[#allocation6 + $0x1e8] sm:$0xff]  }
  0x49   :  { %989 = vmatpush3.bf16.msra.mxu0 %v1123_v18  ;;  %v1155_v58 = vld [vmem:[#allocation6 + $0x120] sm:$0xff]   ;;  %v1159_v62 = vld [vmem:[#allocation6 + $0x128] sm:$0xff]   ;;  %v1161_v0 = vld [vmem:[#allocation6 + $0x170] sm:$0xff]  }
  0x4a   :  { %1011 = vmatpush3.bf16.msra.mxu1 %v1124_v19  ;;  %990 = vmatprep.subr.bf16.mxu0 %v1125_v20  ;;  %v1156_v59 = vld [vmem:[#allocation6 + $0x1a0] sm:$0xff]   ;;  %v1160_v63 = vld [vmem:[#allocation6 + $0x1a8] sm:$0xff]   ;;  %v1162_v1 = vld [vmem:[#allocation6 + $0x1f0] sm:$0xff]  }
  0x4b   :  { %1012 = vmatprep.subr.bf16.mxu1 %v1126_v21  ;;  %v1163_v2 = vld [vmem:[#allocation6 + $0x130] sm:$0xff]   ;;  %v1165_v4 = vld [vmem:[#allocation6 + $0x178] sm:$0xff]   ;;  %v71_v8 = vld [vmem:[#allocation3 + $0x28] sm:$0xff] }
  0x4c   :  { %v1164_v3 = vld [vmem:[#allocation6 + $0x1b0] sm:$0xff]   ;;  %v1166_v5 = vld [vmem:[#allocation6 + $0x1f8] sm:$0xff]   ;;  %v79_v10 = vpack.c.bf16 %v71_v8, %v71_v8  ;;  %v70_v12 = vld [vmem:[#allocation3 + $0x20] sm:$0xff] }
  0x4d   :  { %991 = vmatpush3.bf16.msra.mxu0 %v1127_v22  ;;  %v1167_v6 = vld [vmem:[#allocation6 + $0x138] sm:$0xff]   ;;  %v72_v13 = vld [vmem:[#allocation3 + $0x30] sm:$0xff]  ;;  %v78_v14 = vpack.c.bf16 %v70_v12, %v70_v12  ;;  %v1169_v16 = vld [vmem:[#allocation8] sm:$0xff]  }
  0x4e   :  { %1013 = vmatpush3.bf16.msra.mxu1 %v1128_v23  ;;  %992 = vmatprep.subr.bf16.mxu0 %v1129_v24  ;;  %v1168_v7 = vld [vmem:[#allocation6 + $0x1b8] sm:$0xff]   ;;  %v80_v15 = vpack.c.bf16 %v72_v13, %v72_v13  ;;  %v1170_v18 = vld [vmem:[#allocation8 + $0x8] sm:$0xff]   ;;  %v1171_v19 = vld [vmem:[#allocation8 + $0x10] sm:$0xff]  }
  0x4f   :  { %1014 = vmatprep.subr.bf16.mxu1 %v1130_v25  ;;  %v73_v9 = vld [vmem:[#allocation3 + $0x38] sm:$0xff]  ;;  %v1173_v21 = vld [vmem:[#allocation8 + $0x20] sm:$0xff]   ;;  %v1174_v22 = vld [vmem:[#allocation8 + $0x28] sm:$0xff]  }
  0x50   :  { %v81_v11 = vpack.c.bf16 %v73_v9, %v73_v9  ;;  %v1172_v20 = vld [vmem:[#allocation8 + $0x18] sm:$0xff]   ;;  %v1175_v23 = vld [vmem:[#allocation8 + $0x30] sm:$0xff]  }
  0x51   :  { %993 = vmatpush3.bf16.msra.mxu0 %v1131_v26  ;;  %v1176_v24 = vld [vmem:[#allocation8 + $0x38] sm:$0xff]  }
  0x52   :  { %1015 = vmatpush3.bf16.msra.mxu1 %v1132_v27  ;;  %994 = vmatprep.subr.bf16.mxu0 %v1133_v28 }
  0x53   :  { %1016 = vmatprep.subr.bf16.mxu1 %v1134_v29 }
  0x55   :  { %995 = vmatpush3.bf16.msra.mxu0 %v1135_v30 }
  0x56   :  { %1017 = vmatpush3.bf16.msra.mxu1 %v1136_v31  ;;  %1024 = vmatprep.subr.bf16.mxu0 %v1137_v40 }
  0x57   :  { %1046 = vmatprep.subr.bf16.mxu1 %v1138_v41 }
  0x58   :  { %633 = vmatmul.mubr.bf16.vlgmr.msra.gmra.mrb[0].mxu0 %v74_v37 }
  0x59   :  { %673 = vmatmul.mubr.bf16.vlgmr.msra.gmra.mrb[0].mxu1 %v76_v39  ;;  %1025 = vmatpush3.bf16.msra.mxu0 %v1139_v42 }
  0x5a   :  { %1047 = vmatpush3.bf16.msra.mxu1 %v1140_v43  ;;  %1026 = vmatprep.subr.bf16.mxu0 %v1141_v44 }
  0x5b   :  { %1048 = vmatprep.subr.bf16.mxu1 %v1142_v45  ;;  %712 = vmatprep.mubr.bf16.mxu0 %v79_v10 }
  0x5c   :  { %752 = vmatprep.mubr.bf16.mxu1 %v81_v11 }
  0x5d   :  { %1027 = vmatpush3.bf16.msra.mxu0 %v1143_v46 }
  0x5e   :  { %1049 = vmatpush3.bf16.msra.mxu1 %v1144_v47  ;;  %1028 = vmatprep.subr.bf16.mxu0 %v1145_v48  ;;  %v970_v47 = vld [vmem:[%s1371_s2] ss:$0 sm:$0xff] }
  0x5f   :  { %1050 = vmatprep.subr.bf16.mxu1 %v1146_v49 }
  0x61   :  { %1029 = vmatpush3.bf16.msra.mxu0 %v1147_v50 }
  0x62   :  { %1051 = vmatpush3.bf16.msra.mxu1 %v1148_v51  ;;  %1030 = vmatprep.subr.bf16.mxu0 %v1149_v52  ;;  %v971_v52 = vld [vmem:[%s1373_s4] ss:$0 sm:$0xff] }
  0x63   :  { %1052 = vmatprep.subr.bf16.mxu1 %v1150_v53 }
  0x65   :  { %1031 = vmatpush3.bf16.msra.mxu0 %v1151_v54 }
  0x66   :  { %1053 = vmatpush3.bf16.msra.mxu1 %v1152_v55  ;;  %1032 = vmatprep.subr.bf16.mxu0 %v1153_v56 }
  0x67   :  { %1054 = vmatprep.subr.bf16.mxu1 %v1154_v57 }
  0x69   :  { %1033 = vmatpush3.bf16.msra.mxu0 %v1155_v58 }
  0x6a   :  { %1055 = vmatpush3.bf16.msra.mxu1 %v1156_v59  ;;  %1034 = vmatprep.subr.bf16.mxu0 %v1157_v60 }
  0x6b   :  { %1056 = vmatprep.subr.bf16.mxu1 %v1158_v61 }
  0x6d   :  { %1035 = vmatpush3.bf16.msra.mxu0 %v1159_v62 }
  0x6e   :  { %1057 = vmatpush3.bf16.msra.mxu1 %v1160_v63  ;;  %1036 = vmatprep.subr.bf16.mxu0 %v1161_v0 }
  0x6f   :  { %1058 = vmatprep.subr.bf16.mxu1 %v1162_v1 }
  0x71   :  { %1037 = vmatpush3.bf16.msra.mxu0 %v1163_v2 }
  0x72   :  { %1059 = vmatpush3.bf16.msra.mxu1 %v1164_v3  ;;  %1038 = vmatprep.subr.bf16.mxu0 %v1165_v4 }
  0x73   :  { %1060 = vmatprep.subr.bf16.mxu1 %v1166_v5 }
  0x75   :  { %1039 = vmatpush3.bf16.msra.mxu0 %v1167_v6 }
  0x76   :  { %1061 = vmatpush3.bf16.msra.mxu1 %v1168_v7  ;;  %1077 = vmatprep.subr.bf16.mxu0 %v1276_v17 }
  0x78   :  { %713 = vmatmul.mubr.bf16.vlgmr.msra.gmra.mrb[4].mxu0 %v78_v14 }
  0x79   :  { %753 = vmatmul.mubr.bf16.vlgmr.msra.gmra.mrb[4].mxu1 %v80_v15  ;;  %1078 = vmatpush3.bf16.msra.mxu0 %v1169_v16 }
  0x7a   :  { %1079 = vmatprep.subr.bf16.mxu0 %v1276_v17  ;;  %1093 = vmatprep.mubr.msk.bf16.mxu0 %vm1277_vm0, %v1276_v17 }
  0x7d   :  { %1080 = vmatpush3.bf16.msra.mxu0 %v1170_v18 }
  0x7e   :  { %1081 = vmatprep.subr.bf16.mxu0 %v1276_v17 }
  0x81   :  { %1082 = vmatpush3.bf16.msra.mxu0 %v1171_v19 }
  0x82   :  { %1083 = vmatprep.subr.bf16.mxu0 %v1276_v17 }
  0x85   :  { %1084 = vmatpush3.bf16.msra.mxu0 %v1172_v20 }
  0x86   :  { %1085 = vmatprep.subr.bf16.mxu0 %v1276_v17 }
  0x89   :  { %1086 = vmatpush3.bf16.msra.mxu0 %v1173_v21 }
  0x8a   :  { %1087 = vmatprep.subr.bf16.mxu0 %v1276_v17 }
  0x8d   :  { %1088 = vmatpush3.bf16.msra.mxu0 %v1174_v22 }
  0x8e   :  { %1089 = vmatprep.subr.bf16.mxu0 %v1276_v17 }
  0x91   :  { %1090 = vmatpush3.bf16.msra.mxu0 %v1175_v23 }
  0x92   :  { %1091 = vmatprep.subr.bf16.mxu0 %v1276_v17 }
  0x95   :  { %1092 = vmatpush3.bf16.msra.mxu0 %v1176_v24 }
 0x12b   :  { %v996_v25 = vpop.f32.mrb[0].mxu0 }
 0x12c   :  { %v1018_v26 = vpop.f32.mrb[0].mxu1  ;;  %v997_v27 = vpop.f32.mrb[1].mxu0 }
 0x12d   :  { %v1019_v28 = vpop.f32.mrb[1].mxu1  ;;  %v998_v29 = vadd.f32 %v997_v27, %v996_v25  ;;  %v999_v31 = vpop.f32.mrb[2].mxu0 }
 0x12e   :  { %v1020_v30 = vadd.f32 %v1019_v28, %v1018_v26  ;;  %v1021_v32 = vpop.f32.mrb[2].mxu1  ;;  %v1000_v33 = vpop.f32.mrb[3].mxu0 }
 0x12f   :  { %v1022_v34 = vpop.f32.mrb[3].mxu1 }
 0x130   :  { %v675_v35 = vadd.f32 %v1020_v30, %v998_v29 }
 0x14b   :  { %v1040_v36 = vpop.f32.mrb[4].mxu0 }
 0x14c   :  { %v1062_v37 = vpop.f32.mrb[4].mxu1  ;;  %v1041_v38 = vpop.f32.mrb[5].mxu0 }
 0x14d   :  { %v1042_v39 = vadd.f32 %v1041_v38, %v1040_v36  ;;  %v1063_v40 = vpop.f32.mrb[5].mxu1  ;;  %v1043_v41 = vpop.f32.mrb[6].mxu0 }
 0x14e   :  { %v1064_v42 = vadd.f32 %v1063_v40, %v1062_v37  ;;  %v1065_v43 = vpop.f32.mrb[6].mxu1  ;;  %v1044_v44 = vpop.f32.mrb[7].mxu0 }
 0x14f   :  { %v715_v45 = vadd.f32 %v1042_v39, %v675_v35  ;;  %v1066_v46 = vpop.f32.mrb[7].mxu1 }
 0x151   :  { %v755_v48 = vadd.f32 %v1064_v42, %v715_v45 }
 0x153   :  { %v773_v49 = vadd.f32 %v970_v47, %v755_v48 }
 0x155   :  { %v774_v50 = vmax.f32 %v773_v49, 0.0 }
 0x157   :  { %v775_v51 = vpack.c.bf16 %v774_v50, %v774_v50 }
 0x159   :  { %1094 = vmatmul.mubr.bf16.vlgmr.msra.gmra.mrb[8].mxu0 %v775_v51 }
 0x22c   :  { %v881_v53 = vpop.f32.mrb[8].mxu0 }
 0x22d   :  { %v882_v54 = vadd.f32 %v971_v52, %v881_v53  ;;  %v1095_v55 = vpop.f32.mrb[9].mxu0 }
 0x22e   :  { %v884_v56 = vpop.f32.mrb[10].mxu0 }
 0x22f   :  { %887 = vst [vmem:[#allocation9] sm:$0xff] %v882_v54  ;;  %v1096_v57 = vpop.f32.mrb[11].mxu0 }
 0x230   :  { %1254 = shalt.err (!%p1251_p0)
}
 0x231   :  { %s1255_s4 = scalar_lea.hbm %s1374_s5, 128 }
 0x232   :  { %p1256_p1 = scmp.ne.s32.totalorder %s1374_s5, %s1255_s4  ;;  %p1259_p2 = scmp.lt.u32.totalorder %s1255_s4, %s1374_s5 }
 0x234   :  { %p1261_p3 = pnand %p1259_p2, %p1256_p1 }
 0x236   :  { %1264 = shalt.err (!%p1261_p3)
}
 0x237   :  { %897 = dma.vmem_to_hbm [thread:$0]  %s895_s8, 128, %s1374_s5, [#allocation5]  }
 0x238   :  { %1269 = dma.done.wait [#allocation5], 128  }
 0x239   :  { %1270 = vsyncadd [#allocation5], 4294967168 }
 0x23a   :  { %901 = vsyncpa [#allocation4], 1 }
 0x23b   :  { %902 = vsyncpa [#allocation7], 1 }
 0x23c   :  { %903 = vsyncpa [#allocation5], 1 }

// kernel: tpu_custom_call.1
= control target key start
LH: loop header
LB: loop body
LE: loop exit
PB: predicated region body
PF: predicated region fallthrough
CT: control target
= control target key end

     0   :  { %10 = vsyncpa [#allocation4], 0  ;;  %s1369_s0 = inlined_call_operand.hbm [shape: f32[8,1024], index: 0, kind: input, shape index: {}]   ;;  %s1370_s1 = inlined_call_operand.hbm [shape: bf16[1024,128], index: 1, kind: input, shape index: {}]   ;;  %s1371_s2 = inlined_call_operand.vmem [shape: f32[1,128], index: 2, kind: input, shape index: {}]   ;;  %s1372_s3 = inlined_call_operand.hbm [shape: bf16[128,128], index: 3, kind: input, shape index: {}]   ;;  %s1373_s4 = inlined_call_operand.vmem [shape: f32[1,128], index: 4, kind: input, shape index: {}]   ;;  %s1374_s5 = inlined_call_operand.hbm [shape: f32[8,128], index: 5, kind: output, shape index: {}]  }
   0x1   :  { %11 = vsyncpa [#allocation7], 0 }
   0x2   :  { %12 = vsyncpa [#allocation5], 0  ;;  %s1271_s18 = smov [#allocation6]   ;;  %s1177_s22 = scalar_lea.hbm %s1370_s1, 8192 }
   0x3   :  { %s28_s19 = sshll.u32 %s1271_s18, 4  ;;  %p1178_p0 = scmp.ne.s32.totalorder %s1370_s1, %s1177_s22  ;;  %s29_s19 = int_to_ptr.vmem [resolvable:$true] %s28_s19 }
   0x4   :  { %p1181_p1 = scmp.lt.u32.totalorder %s1177_s22, %s1370_s1 }
   0x6   :  { %p1183_p2 = pnand %p1181_p1, %p1178_p0 }
   0x8   :  { %1186 = shalt.err (!%p1183_p2)
}
   0x9   :  { %s1187_s27 = scalar_lea.vmem %s29_s19, 8192  ;;  %p1192_p4 = scmp.lt.s32.totalorder %s29_s19, %s29_s19 }
   0xa   :  { %p1188_p3 = scmp.ne.s32.totalorder %s29_s19, %s1187_s27  ;;  %p1193_p5 = scmp.lt.s32.totalorder %s1187_s27, %s1187_s27 }
   0xc   :  { %p1194_p6 = por %p1193_p5, %p1192_p4 }
   0xe   :  { %p1195_p7 = pnand %p1194_p6, %p1188_p3 }
  0x10   :  { %1198 = shalt.err (!%p1195_p7)
}
  0x11   :  { %s1272_s28 = smov 64   ;;  %s1273_s29 = smov 4  }
  0x12   :  { %34 = dma.hbm_to_vmem [thread:$0]  %s1370_s1, 8192, %s29_s19, [#allocation7], %s1272_s28, %s1272_s28, %s1273_s29  }
  0x13   :  { %s1274_s7 = smov [#allocation3]   ;;  %s1275_s9 = smov [#allocation8]  }
  0x14   :  { %s19_s8 = sshll.u32 %s1274_s7, 4  ;;  %s42_s10 = sshll.u32 %s1275_s9, 4  ;;  %s20_s8 = int_to_ptr.vmem [resolvable:$true] %s19_s8  ;;  %s43_s10 = int_to_ptr.vmem [resolvable:$true] %s42_s10 }
  0x15   :  { %s1199_s13 = scalar_lea.hbm %s1369_s0, 1024 }
  0x16   :  { %p1200_p8 = scmp.ne.s32.totalorder %s1369_s0, %s1199_s13  ;;  %p1203_p9 = scmp.lt.u32.totalorder %s1199_s13, %s1369_s0 }
  0x18   :  { %p1205_p10 = pnand %p1203_p9, %p1200_p8 }
  0x1a   :  { %1208 = shalt.err (!%p1205_p10)
}
  0x1b   :  { %s1209_s1 = scalar_lea.vmem %s20_s8, 1024  ;;  %p1214_p12 = scmp.lt.s32.totalorder %s20_s8, %s20_s8 }
  0x1c   :  { %p1210_p11 = scmp.ne.s32.totalorder %s20_s8, %s1209_s1  ;;  %p1215_p13 = scmp.lt.s32.totalorder %s1209_s1, %s1209_s1 }
  0x1e   :  { %p1216_p0 = por %p1215_p13, %p1214_p12 }
  0x20   :  { %p1217_p1 = pnand %p1216_p0, %p1210_p11 }
  0x22   :  { %1220 = shalt.err (!%p1217_p1)
}
  0x23   :  { %22 = dma.hbm_to_vmem [thread:$0]  %s1369_s0, 1024, %s20_s8, [#allocation4]  }
  0x24   :  { %s1221_s22 = scalar_lea.hbm %s1372_s3, 1024 }
  0x25   :  { %p1222_p2 = scmp.ne.s32.totalorder %s1372_s3, %s1221_s22  ;;  %p1225_p3 = scmp.lt.u32.totalorder %s1221_s22, %s1372_s3 }
  0x27   :  { %p1227_p4 = pnand %p1225_p3, %p1222_p2 }
  0x29   :  { %1230 = shalt.err (!%p1227_p4)
}
  0x2a   :  { %s1231_s27 = scalar_lea.vmem %s43_s10, 1024  ;;  %p1236_p6 = scmp.lt.s32.totalorder %s43_s10, %s43_s10 }
  0x2b   :  { %p1232_p5 = scmp.ne.s32.totalorder %s43_s10, %s1231_s27  ;;  %p1237_p7 = scmp.lt.s32.totalorder %s1231_s27, %s1231_s27 }
  0x2d   :  { %p1238_p8 = por %p1237_p7, %p1236_p6 }
  0x2f   :  { %p1239_p9 = pnand %p1238_p8, %p1232_p5 }
  0x31   :  { %1242 = shalt.err (!%p1239_p9)
}
  0x32   :  { %48 = dma.hbm_to_vmem [thread:$0]  %s1372_s3, 1024, %s43_s10, [#allocation7], %s1272_s28, %s1272_s28, %s1273_s29  }
  0x33   :  { %1265 = dma.done.wait [#allocation4], 1024  }
  0x34   :  { %1266 = vsyncadd [#allocation4], 4294966272 }
  0x35   :  { %1267 = dma.done.wait [#allocation7], 9216  }
  0x36   :  { %1268 = vsyncadd [#allocation7], 4294958080  ;;  %v1105_v0 = vld [vmem:[#allocation6 + $0x40] sm:$0xff]   ;;  %v1109_v4 = vld [vmem:[#allocation6 + $0x48] sm:$0xff]   ;;  %vm1277_vm0 = vmmov 0   ;;  %s1278_s7 = smov [#allocation9]  }
  0x37   :  { %v1106_v1 = vld [vmem:[#allocation6 + $0xc0] sm:$0xff]   ;;  %980 = vmatprep.subr.bf16.mxu0 %v1105_v0  ;;  %v1110_v5 = vld [vmem:[#allocation6 + $0xc8] sm:$0xff]   ;;  %v1113_v8 = vld [vmem:[#allocation6 + $0x50] sm:$0xff]   ;;  %s894_s8 = sshll.u32 %s1278_s7, 4  ;;  %s895_s8 = int_to_ptr.vmem [resolvable:$true] %s894_s8 }
  0x38   :  { %v1107_v2 = vld [vmem:[#allocation6] sm:$0xff]   ;;  %1002 = vmatprep.subr.bf16.mxu1 %v1106_v1  ;;  %v1111_v6 = vld [vmem:[#allocation6 + $0x8] sm:$0xff]   ;;  %v1114_v9 = vld [vmem:[#allocation6 + $0xd0] sm:$0xff]   ;;  %s1243_s9 = scalar_lea.vmem %s895_s8, 128  ;;  %p1248_p11 = scmp.lt.s32.totalorder %s895_s8, %s895_s8 }
  0x39   :  { %v1108_v3 = vld [vmem:[#allocation6 + $0x80] sm:$0xff]   ;;  %981 = vmatpush3.bf16.msra.mxu0 %v1107_v2  ;;  %v1112_v7 = vld [vmem:[#allocation6 + $0x88] sm:$0xff]   ;;  %v1115_v10 = vld [vmem:[#allocation6 + $0x10] sm:$0xff]   ;;  %p1244_p10 = scmp.ne.s32.totalorder %s895_s8, %s1243_s9  ;;  %p1249_p12 = scmp.lt.s32.totalorder %s1243_s9, %s1243_s9 }
  0x3a   :  { %1003 = vmatpush3.bf16.msra.mxu1 %v1108_v3  ;;  %982 = vmatprep.subr.bf16.mxu0 %v1109_v4  ;;  %v1116_v11 = vld [vmem:[#allocation6 + $0x90] sm:$0xff]   ;;  %v1117_v12 = vld [vmem:[#allocation6 + $0x58] sm:$0xff]   ;;  %v1121_v16 = vld [vmem:[#allocation6 + $0x60] sm:$0xff]  }
  0x3b   :  { %1004 = vmatprep.subr.bf16.mxu1 %v1110_v5  ;;  %v1118_v13 = vld [vmem:[#allocation6 + $0xd8] sm:$0xff]   ;;  %v1122_v17 = vld [vmem:[#allocation6 + $0xe0] sm:$0xff]   ;;  %v1125_v20 = vld [vmem:[#allocation6 + $0x68] sm:$0xff]   ;;  %p1250_p13 = por %p1249_p12, %p1248_p11 }
  0x3c   :  { %v1119_v14 = vld [vmem:[#allocation6 + $0x18] sm:$0xff]   ;;  %v1123_v18 = vld [vmem:[#allocation6 + $0x20] sm:$0xff]   ;;  %v1126_v21 = vld [vmem:[#allocation6 + $0xe8] sm:$0xff]  }
  0x3d   :  { %983 = vmatpush3.bf16.msra.mxu0 %v1111_v6  ;;  %v1120_v15 = vld [vmem:[#allocation6 + $0x98] sm:$0xff]   ;;  %v1124_v19 = vld [vmem:[#allocation6 + $0xa0] sm:$0xff]   ;;  %v1127_v22 = vld [vmem:[#allocation6 + $0x28] sm:$0xff]   ;;  %p1251_p0 = pnand %p1250_p13, %p1244_p10 }
  0x3e   :  { %1005 = vmatpush3.bf16.msra.mxu1 %v1112_v7  ;;  %984 = vmatprep.subr.bf16.mxu0 %v1113_v8  ;;  %v1128_v23 = vld [vmem:[#allocation6 + $0xa8] sm:$0xff]   ;;  %v1129_v24 = vld [vmem:[#allocation6 + $0x70] sm:$0xff]   ;;  %v1133_v28 = vld [vmem:[#allocation6 + $0x78] sm:$0xff]  }
  0x3f   :  { %1006 = vmatprep.subr.bf16.mxu1 %v1114_v9  ;;  %v1130_v25 = vld [vmem:[#allocation6 + $0xf0] sm:$0xff]   ;;  %v1134_v29 = vld [vmem:[#allocation6 + $0xf8] sm:$0xff]   ;;  %v67_v32 = vld [vmem:[#allocation3 + $0x8] sm:$0xff] }
  0x40   :  { %v1131_v26 = vld [vmem:[#allocation6 + $0x30] sm:$0xff]   ;;  %v1135_v30 = vld [vmem:[#allocation6 + $0x38] sm:$0xff]   ;;  %v66_v34 = vld [vmem:[#allocation3] sm:$0xff]  ;;  %v75_v35 = vpack.c.bf16 %v67_v32, %v67_v32 }
  0x41   :  { %985 = vmatpush3.bf16.msra.mxu0 %v1115_v10  ;;  %v1132_v27 = vld [vmem:[#allocation6 + $0xb0] sm:$0xff]   ;;  %v1136_v31 = vld [vmem:[#allocation6 + $0xb8] sm:$0xff]   ;;  %v74_v37 = vpack.c.bf16 %v66_v34, %v66_v34  ;;  %v1137_v40 = vld [vmem:[#allocation6 + $0x140] sm:$0xff]  }
  0x42   :  { %1007 = vmatpush3.bf16.msra.mxu1 %v1116_v11  ;;  %986 = vmatprep.subr.bf16.mxu0 %v1117_v12  ;;  %v69_v33 = vld [vmem:[#allocation3 + $0x18] sm:$0xff]  ;;  %v68_v38 = vld [vmem:[#allocation3 + $0x10] sm:$0xff]  ;;  %v1138_v41 = vld [vmem:[#allocation6 + $0x1c0] sm:$0xff]  }
  0x43   :  { %1008 = vmatprep.subr.bf16.mxu1 %v1118_v13  ;;  %v77_v36 = vpack.c.bf16 %v69_v33, %v69_v33  ;;  %v76_v39 = vpack.c.bf16 %v68_v38, %v68_v38  ;;  %632 = vmatprep.mubr.bf16.mxu0 %v75_v35  ;;  %v1139_v42 = vld [vmem:[#allocation6 + $0x100] sm:$0xff]   ;;  %v1141_v44 = vld [vmem:[#allocation6 + $0x148] sm:$0xff]   ;;  %v1145_v48 = vld [vmem:[#allocation6 + $0x150] sm:$0xff]  }
  0x44   :  { %v1140_v43 = vld [vmem:[#allocation6 + $0x180] sm:$0xff]   ;;  %v1142_v45 = vld [vmem:[#allocation6 + $0x1c8] sm:$0xff]   ;;  %v1146_v49 = vld [vmem:[#allocation6 + $0x1d0] sm:$0xff]  }
  0x45   :  { %987 = vmatpush3.bf16.msra.mxu0 %v1119_v14  ;;  %672 = vmatprep.mubr.bf16.mxu1 %v77_v36  ;;  %v1143_v46 = vld [vmem:[#allocation6 + $0x108] sm:$0xff]   ;;  %v1147_v50 = vld [vmem:[#allocation6 + $0x110] sm:$0xff]   ;;  %v1149_v52 = vld [vmem:[#allocation6 + $0x158] sm:$0xff]  }
  0x46   :  { %1009 = vmatpush3.bf16.msra.mxu1 %v1120_v15  ;;  %988 = vmatprep.subr.bf16.mxu0 %v1121_v16  ;;  %v1144_v47 = vld [vmem:[#allocation6 + $0x188] sm:$0xff]   ;;  %v1148_v51 = vld [vmem:[#allocation6 + $0x190] sm:$0xff]   ;;  %v1150_v53 = vld [vmem:[#allocation6 + $0x1d8] sm:$0xff]  }
  0x47   :  { %1010 = vmatprep.subr.bf16.mxu1 %v1122_v17  ;;  %v1151_v54 = vld [vmem:[#allocation6 + $0x118] sm:$0xff]   ;;  %v1153_v56 = vld [vmem:[#allocation6 + $0x160] sm:$0xff]   ;;  %v1157_v60 = vld [vmem:[#allocation6 + $0x168] sm:$0xff]   ;;  %v1276_v17 = vmov 0.0  }
  0x48   :  { %v1152_v55 = vld [vmem:[#allocation6 + $0x198] sm:$0xff]   ;;  %v1154_v57 = vld [vmem:[#allocation6 + $0x1e0] sm:$0xff]   ;;  %v1158_v61 = vld [vmem:[#allocation6 + $0x1e8] sm:$0xff]  }
  0x49   :  { %989 = vmatpush3.bf16.msra.mxu0 %v1123_v18  ;;  %v1155_v58 = vld [vmem:[#allocation6 + $0x120] sm:$0xff]   ;;  %v1159_v62 = vld [vmem:[#allocation6 + $0x128] sm:$0xff]   ;;  %v1161_v0 = vld [vmem:[#allocation6 + $0x170] sm:$0xff]  }
  0x4a   :  { %1011 = vmatpush3.bf16.msra.mxu1 %v1124_v19  ;;  %990 = vmatprep.subr.bf16.mxu0 %v1125_v20  ;;  %v1156_v59 = vld [vmem:[#allocation6 + $0x1a0] sm:$0xff]   ;;  %v1160_v63 = vld [vmem:[#allocation6 + $0x1a8] sm:$0xff]   ;;  %v1162_v1 = vld [vmem:[#allocation6 + $0x1f0] sm:$0xff]  }
  0x4b   :  { %1012 = vmatprep.subr.bf16.mxu1 %v1126_v21  ;;  %v1163_v2 = vld [vmem:[#allocation6 + $0x130] sm:$0xff]   ;;  %v1165_v4 = vld [vmem:[#allocation6 + $0x178] sm:$0xff]   ;;  %v71_v8 = vld [vmem:[#allocation3 + $0x28] sm:$0xff] }
  0x4c   :  { %v1164_v3 = vld [vmem:[#allocation6 + $0x1b0] sm:$0xff]   ;;  %v1166_v5 = vld [vmem:[#allocation6 + $0x1f8] sm:$0xff]   ;;  %v79_v10 = vpack.c.bf16 %v71_v8, %v71_v8  ;;  %v70_v12 = vld [vmem:[#allocation3 + $0x20] sm:$0xff] }
  0x4d   :  { %991 = vmatpush3.bf16.msra.mxu0 %v1127_v22  ;;  %v1167_v6 = vld [vmem:[#allocation6 + $0x138] sm:$0xff]   ;;  %v72_v13 = vld [vmem:[#allocation3 + $0x30] sm:$0xff]  ;;  %v78_v14 = vpack.c.bf16 %v70_v12, %v70_v12  ;;  %v1169_v16 = vld [vmem:[#allocation8] sm:$0xff]  }
  0x4e   :  { %1013 = vmatpush3.bf16.msra.mxu1 %v1128_v23  ;;  %992 = vmatprep.subr.bf16.mxu0 %v1129_v24  ;;  %v1168_v7 = vld [vmem:[#allocation6 + $0x1b8] sm:$0xff]   ;;  %v80_v15 = vpack.c.bf16 %v72_v13, %v72_v13  ;;  %v1170_v18 = vld [vmem:[#allocation8 + $0x8] sm:$0xff]   ;;  %v1171_v19 = vld [vmem:[#allocation8 + $0x10] sm:$0xff]  }
  0x4f   :  { %1014 = vmatprep.subr.bf16.mxu1 %v1130_v25  ;;  %v73_v9 = vld [vmem:[#allocation3 + $0x38] sm:$0xff]  ;;  %v1173_v21 = vld [vmem:[#allocation8 + $0x20] sm:$0xff]   ;;  %v1174_v22 = vld [vmem:[#allocation8 + $0x28] sm:$0xff]  }
  0x50   :  { %v81_v11 = vpack.c.bf16 %v73_v9, %v73_v9  ;;  %v1172_v20 = vld [vmem:[#allocation8 + $0x18] sm:$0xff]   ;;  %v1175_v23 = vld [vmem:[#allocation8 + $0x30] sm:$0xff]  }
  0x51   :  { %993 = vmatpush3.bf16.msra.mxu0 %v1131_v26  ;;  %v1176_v24 = vld [vmem:[#allocation8 + $0x38] sm:$0xff]  }
  0x52   :  { %1015 = vmatpush3.bf16.msra.mxu1 %v1132_v27  ;;  %994 = vmatprep.subr.bf16.mxu0 %v1133_v28 }
  0x53   :  { %1016 = vmatprep.subr.bf16.mxu1 %v1134_v29 }
  0x55   :  { %995 = vmatpush3.bf16.msra.mxu0 %v1135_v30 }
  0x56   :  { %1017 = vmatpush3.bf16.msra.mxu1 %v1136_v31  ;;  %1024 = vmatprep.subr.bf16.mxu0 %v1137_v40 }
  0x57   :  { %1046 = vmatprep.subr.bf16.mxu1 %v1138_v41 }
  0x58   :  { %633 = vmatmul.mubr.bf16.vlgmr.msra.gmra.mrb[0].mxu0 %v74_v37 }
  0x59   :  { %673 = vmatmul.mubr.bf16.vlgmr.msra.gmra.mrb[0].mxu1 %v76_v39  ;;  %1025 = vmatpush3.bf16.msra.mxu0 %v1139_v42 }
  0x5a   :  { %1047 = vmatpush3.bf16.msra.mxu1 %v1140_v43  ;;  %1026 = vmatprep.subr.bf16.mxu0 %v1141_v44 }
  0x5b   :  { %1048 = vmatprep.subr.bf16.mxu1 %v1142_v45  ;;  %712 = vmatprep.mubr.bf16.mxu0 %v79_v10 }
  0x5c   :  { %752 = vmatprep.mubr.bf16.mxu1 %v81_v11 }
  0x5d   :  { %1027 = vmatpush3.bf16.msra.mxu0 %v1143_v46 }
  0x5e   :  { %1049 = vmatpush3.bf16.msra.mxu1 %v1144_v47  ;;  %1028 = vmatprep.subr.bf16.mxu0 %v1145_v48  ;;  %v970_v47 = vld [vmem:[%s1371_s2] ss:$0 sm:$0xff] }
  0x5f   :  { %1050 = vmatprep.subr.bf16.mxu1 %v1146_v49 }
  0x61   :  { %1029 = vmatpush3.bf16.msra.mxu0 %v1147_v50 }
  0x62   :  { %1051 = vmatpush3.bf16.msra.mxu1 %v1148_v51  ;;  %1030 = vmatprep.subr.bf16.mxu0 %v1149_v52  ;;  %v971_v52 = vld [vmem:[%s1373_s4] ss:$0 sm:$0xff] }
  0x63   :  { %1052 = vmatprep.subr.bf16.mxu1 %v1150_v53 }
  0x65   :  { %1031 = vmatpush3.bf16.msra.mxu0 %v1151_v54 }
  0x66   :  { %1053 = vmatpush3.bf16.msra.mxu1 %v1152_v55  ;;  %1032 = vmatprep.subr.bf16.mxu0 %v1153_v56 }
  0x67   :  { %1054 = vmatprep.subr.bf16.mxu1 %v1154_v57 }
  0x69   :  { %1033 = vmatpush3.bf16.msra.mxu0 %v1155_v58 }
  0x6a   :  { %1055 = vmatpush3.bf16.msra.mxu1 %v1156_v59  ;;  %1034 = vmatprep.subr.bf16.mxu0 %v1157_v60 }
  0x6b   :  { %1056 = vmatprep.subr.bf16.mxu1 %v1158_v61 }
  0x6d   :  { %1035 = vmatpush3.bf16.msra.mxu0 %v1159_v62 }
  0x6e   :  { %1057 = vmatpush3.bf16.msra.mxu1 %v1160_v63  ;;  %1036 = vmatprep.subr.bf16.mxu0 %v1161_v0 }
  0x6f   :  { %1058 = vmatprep.subr.bf16.mxu1 %v1162_v1 }
  0x71   :  { %1037 = vmatpush3.bf16.msra.mxu0 %v1163_v2 }
  0x72   :  { %1059 = vmatpush3.bf16.msra.mxu1 %v1164_v3  ;;  %1038 = vmatprep.subr.bf16.mxu0 %v1165_v4 }
  0x73   :  { %1060 = vmatprep.subr.bf16.mxu1 %v1166_v5 }
  0x75   :  { %1039 = vmatpush3.bf16.msra.mxu0 %v1167_v6 }
  0x76   :  { %1061 = vmatpush3.bf16.msra.mxu1 %v1168_v7  ;;  %1077 = vmatprep.subr.bf16.mxu0 %v1276_v17 }
  0x78   :  { %713 = vmatmul.mubr.bf16.vlgmr.msra.gmra.mrb[4].mxu0 %v78_v14 }
  0x79   :  { %753 = vmatmul.mubr.bf16.vlgmr.msra.gmra.mrb[4].mxu1 %v80_v15  ;;  %1078 = vmatpush3.bf16.msra.mxu0 %v1169_v16 }
  0x7a   :  { %1079 = vmatprep.subr.bf16.mxu0 %v1276_v17  ;;  %1093 = vmatprep.mubr.msk.bf16.mxu0 %vm1277_vm0, %v1276_v17 }
  0x7d   :  { %1080 = vmatpush3.bf16.msra.mxu0 %v1170_v18 }
  0x7e   :  { %1081 = vmatprep.subr.bf16.mxu0 %v1276_v17 }
  0x81   :  { %1082 = vmatpush3.bf16.msra.mxu0 %v1171_v19 }
  0x82   :  { %1083 = vmatprep.subr.bf16.mxu0 %v1276_v17 }
  0x85   :  { %1084 = vmatpush3.bf16.msra.mxu0 %v1172_v20 }
  0x86   :  { %1085 = vmatprep.subr.bf16.mxu0 %v1276_v17 }
  0x89   :  { %1086 = vmatpush3.bf16.msra.mxu0 %v1173_v21 }
  0x8a   :  { %1087 = vmatprep.subr.bf16.mxu0 %v1276_v17 }
  0x8d   :  { %1088 = vmatpush3.bf16.msra.mxu0 %v1174_v22 }
  0x8e   :  { %1089 = vmatprep.subr.bf16.mxu0 %v1276_v17 }
  0x91   :  { %1090 = vmatpush3.bf16.msra.mxu0 %v1175_v23 }
  0x92   :  { %1091 = vmatprep.subr.bf16.mxu0 %v1276_v17 }
  0x95   :  { %1092 = vmatpush3.bf16.msra.mxu0 %v1176_v24 }
 0x12b   :  { %v996_v25 = vpop.f32.mrb[0].mxu0 }
 0x12c   :  { %v1018_v26 = vpop.f32.mrb[0].mxu1  ;;  %v997_v27 = vpop.f32.mrb[1].mxu0 }
 0x12d   :  { %v1019_v28 = vpop.f32.mrb[1].mxu1  ;;  %v998_v29 = vadd.f32 %v997_v27, %v996_v25  ;;  %v999_v31 = vpop.f32.mrb[2].mxu0 }
 0x12e   :  { %v1020_v30 = vadd.f32 %v1019_v28, %v1018_v26  ;;  %v1021_v32 = vpop.f32.mrb[2].mxu1  ;;  %v1000_v33 = vpop.f32.mrb[3].mxu0 }
 0x12f   :  { %v1022_v34 = vpop.f32.mrb[3].mxu1 }
 0x130   :  { %v675_v35 = vadd.f32 %v1020_v30, %v998_v29 }
 0x14b   :  { %v1040_v36 = vpop.f32.mrb[4].mxu0 }
 0x14c   :  { %v1062_v37 = vpop.f32.mrb[4].mxu1  ;;  %v1041_v38 = vpop.f32.mrb[5].mxu0 }
 0x14d   :  { %v1042_v39 = vadd.f32 %v1041_v38, %v1040_v36  ;;  %v1063_v40 = vpop.f32.mrb[5].mxu1  ;;  %v1043_v41 = vpop.f32.mrb[6].mxu0 }
 0x14e   :  { %v1064_v42 = vadd.f32 %v1063_v40, %v1062_v37  ;;  %v1065_v43 = vpop.f32.mrb[6].mxu1  ;;  %v1044_v44 = vpop.f32.mrb[7].mxu0 }
 0x14f   :  { %v715_v45 = vadd.f32 %v1042_v39, %v675_v35  ;;  %v1066_v46 = vpop.f32.mrb[7].mxu1 }
 0x151   :  { %v755_v48 = vadd.f32 %v1064_v42, %v715_v45 }
 0x153   :  { %v773_v49 = vadd.f32 %v970_v47, %v755_v48 }
 0x155   :  { %v774_v50 = vmax.f32 %v773_v49, 0.0 }
 0x157   :  { %v775_v51 = vpack.c.bf16 %v774_v50, %v774_v50 }
 0x159   :  { %1094 = vmatmul.mubr.bf16.vlgmr.msra.gmra.mrb[8].mxu0 %v775_v51 }
 0x22c   :  { %v881_v53 = vpop.f32.mrb[8].mxu0 }
 0x22d   :  { %v882_v54 = vadd.f32 %v971_v52, %v881_v53  ;;  %v1095_v55 = vpop.f32.mrb[9].mxu0 }
 0x22e   :  { %v884_v56 = vpop.f32.mrb[10].mxu0 }
 0x22f   :  { %887 = vst [vmem:[#allocation9] sm:$0xff] %v882_v54  ;;  %v1096_v57 = vpop.f32.mrb[11].mxu0 }
 0x230   :  { %1254 = shalt.err (!%p1251_p0)
}
 0x231   :  { %s1255_s4 = scalar_lea.hbm %s1374_s5, 128 }
 0x232   :  { %p1256_p1 = scmp.ne.s32.totalorder %s1374_s5, %s1255_s4  ;;  %p1259_p2 = scmp.lt.u32.totalorder %s1255_s4, %s1374_s5 }
 0x234   :  { %p1261_p3 = pnand %p1259_p2, %p1256_p1 }
 0x236   :  { %1264 = shalt.err (!%p1261_p3)
}
 0x237   :  { %897 = dma.vmem_to_hbm [thread:$0]  %s895_s8, 128, %s1374_s5, [#allocation5]  }
 0x238   :  { %1269 = dma.done.wait [#allocation5], 128  }
 0x239   :  { %1270 = vsyncadd [#allocation5], 4294967168 }
 0x23a   :  { %901 = vsyncpa [#allocation4], 1 }
 0x23b   :  { %902 = vsyncpa [#allocation7], 1 }
 0x23c   :  { %903 = vsyncpa [#allocation5], 1 }

</bundles_post_ra>
